<compile_context>
chip_gen: v7x
topology: tpu7x:2x2x1
jax: 0.10.0
libtpu: 0.0.40
codegen_flags: <defaults>
</compile_context>

<pallas_src>
import functools
import math

import jax
import jax.numpy as jnp
from jax.experimental import pallas as pl
from jax.experimental.pallas import tpu as pltpu

LANE = 128
NUM_HIDDEN = 3  # fc2, fc3, fc4


def _round_up(v, m):
    return (v + m - 1) // m * m


def mlp_kernel(x_ref, w0_ref, wh_ref, wo_ref, b0_ref, bh_ref, bo_ref, o_ref):
    """Fused 5-layer MLP on one [tile, K0] activation block.

    x_ref : (tile, K0)            f32   raw activations (cast to bf16 in-kernel)
    w0_ref: (K0, P)               bf16  fc1 weight (pre-transposed, lane-padded)
    wh_ref: (NUM_HIDDEN, P, P)    bf16  fc2..fc4 weights
    wo_ref: (P, N)                bf16  fc5 weight
    b0_ref: (1, P) / bh_ref: (NUM_HIDDEN, 1, P) / bo_ref: (1, N)   f32 biases
    o_ref : (tile, N)             bf16  lane-padded output
    """
    # Cast in-kernel: avoids a separate HBM pass over x in the wrapper.
    h = x_ref[...].astype(jnp.bfloat16)

    def layer(h_bf16, w, b, relu):
        # bf16 x bf16 -> f32 accumulation on the MXU.
        acc = jnp.dot(h_bf16, w, preferred_element_type=jnp.float32)
        acc = acc + b                     # bias add in f32 (broadcast (1,*))
        if relu:
            acc = jnp.maximum(acc, 0.0)   # ReLU in f32 (safe on v5e's f32-only VPU)
        return acc.astype(jnp.bfloat16)

    # Dropout layers are identity in eval mode.
    # TODO(synk): add training-mode dropout via pltpu.prng_random_bits if needed.
    h = layer(h, w0_ref[...], b0_ref[...], True)    # fc1 + relu1
    h = layer(h, wh_ref[0], bh_ref[0], True)        # fc2 + relu2
    h = layer(h, wh_ref[1], bh_ref[1], True)        # fc3 + relu3
    h = layer(h, wh_ref[2], bh_ref[2], True)        # fc4 + relu4
    o_ref[...] = layer(h, wo_ref[...], bo_ref[...], False)   # fc5 (no activation)


def pack_mlp_params(params):
    """One-time packing of the 5 (W_t[in,out], b[1,out]) pairs into padded slabs.

    Do this ONCE and reuse across forward calls — it must not sit on the hot path.
    Zero padding is exact: padded lanes hit zero weights/biases and ReLU keeps zero.
    """
    assert len(params) == 2 + NUM_HIDDEN
    (w1, b1), *hidden, (w5, b5) = params
    K0, H = w1.shape
    P = _round_up(H, LANE)
    N = _round_up(w5.shape[1], LANE)

    w0 = jnp.zeros((K0, P), jnp.bfloat16).at[:, :H].set(w1.astype(jnp.bfloat16))
    b0 = jnp.zeros((1, P), jnp.float32).at[:, :b1.shape[1]].set(b1.astype(jnp.float32))

    wh = jnp.zeros((NUM_HIDDEN, P, P), jnp.bfloat16)
    bh = jnp.zeros((NUM_HIDDEN, 1, P), jnp.float32)
    for i, (w, b) in enumerate(hidden):
        wh = wh.at[i, :w.shape[0], :w.shape[1]].set(w.astype(jnp.bfloat16))
        bh = bh.at[i, :, :b.shape[1]].set(b.astype(jnp.float32))

    wo = jnp.zeros((P, N), jnp.bfloat16).at[:w5.shape[0], :w5.shape[1]].set(
        w5.astype(jnp.bfloat16))
    bo = jnp.zeros((1, N), jnp.float32).at[:, :b5.shape[1]].set(b5.astype(jnp.float32))

    return dict(w0=w0, wh=wh, wo=wo, b0=b0, bh=bh, bo=bo)


def _choose_tiling(B):
    """Pick (batch_tile, padded_batch).

    Large batches: 512-row tiles (big enough to amortize ~0.35us/step overhead and
    fill the 256-wide MXU's row stream on v6e/v7x). Small batches: split into two
    tiles so the 'parallel' axis can shard across v7x's two TensorCores.
    """
    if B > 1024:
        tile = 512
    elif B >= 16:
        tile = _round_up(B, 16) // 2     # 2 grid steps, tile is a multiple of 8
    else:
        tile = _round_up(max(B, 8), 8)   # tiny batch: single block
    return tile, _round_up(B, tile)


@functools.partial(jax.jit, static_argnames=("out_features",))
def mlp_forward(x, packed, *, out_features):
    """x: [B, input_size] f32; packed: output of pack_mlp_params (reused across calls)."""
    B, K0 = x.shape
    w0, wh, wo = packed["w0"], packed["wh"], packed["wo"]
    b0, bh, bo = packed["b0"], packed["bh"], packed["bo"]
    assert w0.shape[0] == K0, "input feature dim mismatch with packed params"
    P = w0.shape[1]
    N = wo.shape[1]

    tile, B_pad = _choose_tiling(B)
    if B_pad != B:
        # Only when B is not a tile multiple; padded rows are sliced off below.
        x = jnp.pad(x, ((0, B_pad - B), (0, 0)))
    grid = (B_pad // tile,)

    # Advisory cost estimate (padded work actually executed; bf16 output).
    flops = 2 * B_pad * (K0 * P + NUM_HIDDEN * P * P + P * N)
    bytes_accessed = (B_pad * K0 * x.dtype.itemsize
                      + (w0.size + wh.size + wo.size) * 2
                      + (b0.size + bh.size + bo.size) * 4
                      + B_pad * N * 2)

    # Actual resident VMEM: double-buffered x/out tiles, weight & bias slabs
    # (counted x2 conservatively), plus headroom for in-kernel f32 intermediates.
    resident = (2 * tile * K0 * x.dtype.itemsize
                + 2 * tile * N * 2
                + 2 * ((w0.size + wh.size + wo.size) * 2
                       + (b0.size + bh.size + bo.size) * 4))
    vmem_limit = int(resident + 4 * tile * P * 4 + (4 << 20))

    out_pad = pl.pallas_call(
        mlp_kernel,
        out_shape=jax.ShapeDtypeStruct((B_pad, N), jnp.bfloat16),
        grid_spec=pltpu.PrefetchScalarGridSpec(
            num_scalar_prefetch=0,
            grid=grid,
            in_specs=[
                pl.BlockSpec((tile, K0), lambda i: (i, 0)),
                pl.BlockSpec((K0, P), lambda i: (0, 0)),
                pl.BlockSpec((NUM_HIDDEN, P, P), lambda i: (0, 0, 0)),
                pl.BlockSpec((P, N), lambda i: (0, 0)),
                pl.BlockSpec((1, P), lambda i: (0, 0)),
                pl.BlockSpec((NUM_HIDDEN, 1, P), lambda i: (0, 0, 0)),
                pl.BlockSpec((1, N), lambda i: (0, 0)),
            ],
            out_specs=pl.BlockSpec((tile, N), lambda i: (i, 0)),
        ),
        compiler_params=pltpu.CompilerParams(
            dimension_semantics=("parallel",),
            vmem_limit_bytes=vmem_limit,
        ),
        cost_estimate=pl.CostEstimate(
            flops=flops, transcendentals=0, bytes_accessed=bytes_accessed),
    )(x, w0, wh, wo, b0, bh, bo)

    # Slice the logical output and cast back to the input dtype.
    return out_pad[:B, :out_features].astype(x.dtype)


def init_linear_params(key, in_features, out_features, dtype=jnp.float32):
    """Deterministic init matching nn.Linear's default U(-1/sqrt(in), 1/sqrt(in))."""
    kw, kb = jax.random.split(key)
    bound = 1.0 / math.sqrt(in_features)
    # Stored already transposed: (in, out). Bias as (1, out) for 2-D TPU layout.
    w_t = jax.random.uniform(kw, (in_features, out_features), dtype,
                             minval=-bound, maxval=bound)
    b = jax.random.uniform(kb, (1, out_features), dtype,
                           minval=-bound, maxval=bound)
    return w_t, b


def mlp_reference(x, params):
    h = x
    for i, (w, b) in enumerate(params):
        h = h @ w + b
        if i < len(params) - 1:
            h = jnp.maximum(h, 0.0)
    return h


if __name__ == "__main__":
    input_size, hidden_size, output_size = 32, 64, 16
    batch = 256  # splits into two 128-row tiles -> 2-step parallel grid

    key = jax.random.PRNGKey(0)
    k_x, k1, k2, k3, k4, k5 = jax.random.split(key, 6)

    x = jax.random.normal(k_x, (batch, input_size), jnp.float32)

    params = [
        init_linear_params(k1, input_size, hidden_size),
        init_linear_params(k2, hidden_size, hidden_size),
        init_linear_params(k3, hidden_size, hidden_size),
        init_linear_params(k4, hidden_size, hidden_size),
        init_linear_params(k5, hidden_size, output_size),
    ]

    # One-time packing, hoisted out of the forward path (cache alongside params).
    packed = pack_mlp_params(params)
    packed = jax.tree_util.tree_map(jax.block_until_ready, packed)

    y = mlp_forward(x, packed, out_features=output_size)
    y = jax.block_until_ready(y)

    y_ref = mlp_reference(x, params)  # f32 reference
    assert y.shape == (batch, output_size)
    max_err = float(jnp.max(jnp.abs(y - y_ref)))
    # bf16 operands/intermediates (f32 accumulation) -> loosened tolerance vs f32 ref.
    assert jnp.allclose(y, y_ref, atol=3e-2, rtol=3e-2), (
        f"mismatch vs reference, max |err| = {max_err}")

    print("KERNEL_OK")
</pallas_src>

<mosaic_0001>
module attributes {stable_mosaic.version = 11 : i64} {
  func.func @mlp_kernel(%arg0: i32, %arg1: memref<128x32xf32, #tpu.memory_space<vmem>>, %arg2: memref<32x128xbf16, #tpu.memory_space<vmem>>, %arg3: memref<3x128x128xbf16, #tpu.memory_space<vmem>>, %arg4: memref<128x128xbf16, #tpu.memory_space<vmem>>, %arg5: memref<1x128xf32, #tpu.memory_space<vmem>>, %arg6: memref<3x1x128xf32, #tpu.memory_space<vmem>>, %arg7: memref<1x128xf32, #tpu.memory_space<vmem>>, %arg8: memref<128x128xbf16, #tpu.memory_space<vmem>>) attributes {dimension_semantics = [#tpu.dimension_semantics<parallel>], iteration_bounds = array<i64: 2>, scalar_prefetch = 0 : i64, scratch_operands = 0 : i64, tpu.core_type = #tpu.core_type<tc>, window_params = [{transform_indices = @transform_0, window_bounds = array<i64: 128, 32>}, {pipeline_mode = #tpu.pipeline_mode<synchronous>, transform_indices = @transform_1, window_bounds = array<i64: 32, 128>}, {pipeline_mode = #tpu.pipeline_mode<synchronous>, transform_indices = @transform_2, window_bounds = array<i64: 3, 128, 128>}, {pipeline_mode = #tpu.pipeline_mode<synchronous>, transform_indices = @transform_3, window_bounds = array<i64: 128, 128>}, {pipeline_mode = #tpu.pipeline_mode<synchronous>, transform_indices = @transform_4, window_bounds = array<i64: 1, 128>}, {pipeline_mode = #tpu.pipeline_mode<synchronous>, transform_indices = @transform_5, window_bounds = array<i64: 3, 1, 128>}, {pipeline_mode = #tpu.pipeline_mode<synchronous>, transform_indices = @transform_6, window_bounds = array<i64: 1, 128>}, {transform_indices = @transform_7, window_bounds = array<i64: 128, 128>}]} {
    %c0 = arith.constant 0 : index
    %c0_0 = arith.constant 0 : index
    %0 = vector.load %arg1[%c0, %c0_0] : memref<128x32xf32, #tpu.memory_space<vmem>>, vector<128x32xf32>
    %1 = arith.truncf %0 : vector<128x32xf32> to vector<128x32xbf16>
    %c0_1 = arith.constant 0 : index
    %c0_2 = arith.constant 0 : index
    %2 = vector.load %arg2[%c0_1, %c0_2] : memref<32x128xbf16, #tpu.memory_space<vmem>>, vector<32x128xbf16>
    %c0_3 = arith.constant 0 : index
    %c0_4 = arith.constant 0 : index
    %3 = vector.load %arg5[%c0_3, %c0_4] : memref<1x128xf32, #tpu.memory_space<vmem>>, vector<1x128xf32>
    %cst = arith.constant dense<0.000000e+00> : vector<128x128xf32>
    %4 = tpu.matmul %1, %2, %cst {dimension_numbers = #tpu.dot_dimension_numbers<[1], [0], [0], [1], [0, 0, 1, 1], [], []>} : vector<128x32xbf16>, vector<32x128xbf16>, vector<128x128xf32> -> vector<128x128xf32>
    %5 = vector.broadcast %3 : vector<1x128xf32> to vector<128x128xf32>
    %6 = arith.addf %4, %5 : vector<128x128xf32>
    %cst_5 = arith.constant 0.000000e+00 : f32
    %7 = vector.broadcast %cst_5 : f32 to vector<128x128xf32>
    %8 = arith.maximumf %6, %7 : vector<128x128xf32>
    %9 = arith.truncf %8 : vector<128x128xf32> to vector<128x128xbf16>
    %c0_6 = arith.constant 0 : index
    %c0_7 = arith.constant 0 : index
    %c0_8 = arith.constant 0 : index
    %10 = vector.load %arg3[%c0_6, %c0_7, %c0_8] : memref<3x128x128xbf16, #tpu.memory_space<vmem>>, vector<1x128x128xbf16>
    %11 = vector.shape_cast %10 : vector<1x128x128xbf16> to vector<128x128xbf16>
    %c0_9 = arith.constant 0 : index
    %c0_10 = arith.constant 0 : index
    %c0_11 = arith.constant 0 : index
    %12 = vector.load %arg6[%c0_9, %c0_10, %c0_11] : memref<3x1x128xf32, #tpu.memory_space<vmem>>, vector<1x1x128xf32>
    %13 = vector.shape_cast %12 : vector<1x1x128xf32> to vector<1x128xf32>
    %cst_12 = arith.constant dense<0.000000e+00> : vector<128x128xf32>
    %14 = tpu.matmul %9, %11, %cst_12 {dimension_numbers = #tpu.dot_dimension_numbers<[1], [0], [0], [1], [0, 0, 1, 1], [], []>} : vector<128x128xbf16>, vector<128x128xbf16>, vector<128x128xf32> -> vector<128x128xf32>
    %15 = vector.broadcast %13 : vector<1x128xf32> to vector<128x128xf32>
    %16 = arith.addf %14, %15 : vector<128x128xf32>
    %cst_13 = arith.constant 0.000000e+00 : f32
    %17 = vector.broadcast %cst_13 : f32 to vector<128x128xf32>
    %18 = arith.maximumf %16, %17 : vector<128x128xf32>
    %19 = arith.truncf %18 : vector<128x128xf32> to vector<128x128xbf16>
    %c1 = arith.constant 1 : index
    %c0_14 = arith.constant 0 : index
    %c0_15 = arith.constant 0 : index
    %20 = vector.load %arg3[%c1, %c0_14, %c0_15] : memref<3x128x128xbf16, #tpu.memory_space<vmem>>, vector<1x128x128xbf16>
    %21 = vector.shape_cast %20 : vector<1x128x128xbf16> to vector<128x128xbf16>
    %c1_16 = arith.constant 1 : index
    %c0_17 = arith.constant 0 : index
    %c0_18 = arith.constant 0 : index
    %22 = vector.load %arg6[%c1_16, %c0_17, %c0_18] : memref<3x1x128xf32, #tpu.memory_space<vmem>>, vector<1x1x128xf32>
    %23 = vector.shape_cast %22 : vector<1x1x128xf32> to vector<1x128xf32>
    %cst_19 = arith.constant dense<0.000000e+00> : vector<128x128xf32>
    %24 = tpu.matmul %19, %21, %cst_19 {dimension_numbers = #tpu.dot_dimension_numbers<[1], [0], [0], [1], [0, 0, 1, 1], [], []>} : vector<128x128xbf16>, vector<128x128xbf16>, vector<128x128xf32> -> vector<128x128xf32>
    %25 = vector.broadcast %23 : vector<1x128xf32> to vector<128x128xf32>
    %26 = arith.addf %24, %25 : vector<128x128xf32>
    %cst_20 = arith.constant 0.000000e+00 : f32
    %27 = vector.broadcast %cst_20 : f32 to vector<128x128xf32>
    %28 = arith.maximumf %26, %27 : vector<128x128xf32>
    %29 = arith.truncf %28 : vector<128x128xf32> to vector<128x128xbf16>
    %c2 = arith.constant 2 : index
    %c0_21 = arith.constant 0 : index
    %c0_22 = arith.constant 0 : index
    %30 = vector.load %arg3[%c2, %c0_21, %c0_22] : memref<3x128x128xbf16, #tpu.memory_space<vmem>>, vector<1x128x128xbf16>
    %31 = vector.shape_cast %30 : vector<1x128x128xbf16> to vector<128x128xbf16>
    %c2_23 = arith.constant 2 : index
    %c0_24 = arith.constant 0 : index
    %c0_25 = arith.constant 0 : index
    %32 = vector.load %arg6[%c2_23, %c0_24, %c0_25] : memref<3x1x128xf32, #tpu.memory_space<vmem>>, vector<1x1x128xf32>
    %33 = vector.shape_cast %32 : vector<1x1x128xf32> to vector<1x128xf32>
    %cst_26 = arith.constant dense<0.000000e+00> : vector<128x128xf32>
    %34 = tpu.matmul %29, %31, %cst_26 {dimension_numbers = #tpu.dot_dimension_numbers<[1], [0], [0], [1], [0, 0, 1, 1], [], []>} : vector<128x128xbf16>, vector<128x128xbf16>, vector<128x128xf32> -> vector<128x128xf32>
    %35 = vector.broadcast %33 : vector<1x128xf32> to vector<128x128xf32>
    %36 = arith.addf %34, %35 : vector<128x128xf32>
    %cst_27 = arith.constant 0.000000e+00 : f32
    %37 = vector.broadcast %cst_27 : f32 to vector<128x128xf32>
    %38 = arith.maximumf %36, %37 : vector<128x128xf32>
    %39 = arith.truncf %38 : vector<128x128xf32> to vector<128x128xbf16>
    %c0_28 = arith.constant 0 : index
    %c0_29 = arith.constant 0 : index
    %40 = vector.load %arg4[%c0_28, %c0_29] : memref<128x128xbf16, #tpu.memory_space<vmem>>, vector<128x128xbf16>
    %c0_30 = arith.constant 0 : index
    %c0_31 = arith.constant 0 : index
    %41 = vector.load %arg7[%c0_30, %c0_31] : memref<1x128xf32, #tpu.memory_space<vmem>>, vector<1x128xf32>
    %cst_32 = arith.constant dense<0.000000e+00> : vector<128x128xf32>
    %42 = tpu.matmul %39, %40, %cst_32 {dimension_numbers = #tpu.dot_dimension_numbers<[1], [0], [0], [1], [0, 0, 1, 1], [], []>} : vector<128x128xbf16>, vector<128x128xbf16>, vector<128x128xf32> -> vector<128x128xf32>
    %43 = vector.broadcast %41 : vector<1x128xf32> to vector<128x128xf32>
    %44 = arith.addf %42, %43 : vector<128x128xf32>
    %45 = arith.truncf %44 : vector<128x128xf32> to vector<128x128xbf16>
    %c0_33 = arith.constant 0 : index
    %c0_34 = arith.constant 0 : index
    %46 = vector.load %arg8[%c0_33, %c0_34] : memref<128x128xbf16, #tpu.memory_space<vmem>>, vector<128x128xbf16>
    tpu.vector_store %arg8[%c0_33, %c0_34], %45 {strides = array<i32>} : memref<128x128xbf16, #tpu.memory_space<vmem>>, vector<128x128xbf16>,
    return
  }
  func.func @transform_0(%arg0: i32) -> (i32, i32) {
    %c0_i32 = arith.constant 0 : i32
    %c0_i32_0 = arith.constant 0 : i32
    return %arg0, %c0_i32 : i32, i32
  }
  func.func @transform_1(%arg0: i32) -> (i32, i32) {
    %c0_i32 = arith.constant 0 : i32
    %c0_i32_0 = arith.constant 0 : i32
    %c0_i32_1 = arith.constant 0 : i32
    return %c0_i32, %c0_i32_0 : i32, i32
  }
  func.func @transform_2(%arg0: i32) -> (i32, i32, i32) {
    %c0_i32 = arith.constant 0 : i32
    %c0_i32_0 = arith.constant 0 : i32
    %c0_i32_1 = arith.constant 0 : i32
    %c0_i32_2 = arith.constant 0 : i32
    return %c0_i32, %c0_i32_0, %c0_i32_1 : i32, i32, i32
  }
  func.func @transform_3(%arg0: i32) -> (i32, i32) {
    %c0_i32 = arith.constant 0 : i32
    %c0_i32_0 = arith.constant 0 : i32
    %c0_i32_1 = arith.constant 0 : i32
    return %c0_i32, %c0_i32_0 : i32, i32
  }
  func.func @transform_4(%arg0: i32) -> (i32, i32) {
    %c0_i32 = arith.constant 0 : i32
    %c0_i32_0 = arith.constant 0 : i32
    %c0_i32_1 = arith.constant 0 : i32
    return %c0_i32, %c0_i32_0 : i32, i32
  }
  func.func @transform_5(%arg0: i32) -> (i32, i32, i32) {
    %c0_i32 = arith.constant 0 : i32
    %c0_i32_0 = arith.constant 0 : i32
    %c0_i32_1 = arith.constant 0 : i32
    %c0_i32_2 = arith.constant 0 : i32
    return %c0_i32, %c0_i32_0, %c0_i32_1 : i32, i32, i32
  }
  func.func @transform_6(%arg0: i32) -> (i32, i32) {
    %c0_i32 = arith.constant 0 : i32
    %c0_i32_0 = arith.constant 0 : i32
    %c0_i32_1 = arith.constant 0 : i32
    return %c0_i32, %c0_i32_0 : i32, i32
  }
  func.func @transform_7(%arg0: i32) -> (i32, i32) {
    %c0_i32 = arith.constant 0 : i32
    %c0_i32_0 = arith.constant 0 : i32
    return %arg0, %c0_i32 : i32, i32
  }
}

</mosaic_0001>

<bundles_post_ra>
// kernel: mlp_forward.1
= control target key start
LH: loop header
LB: loop body
LE: loop exit
PB: predicated region body
PF: predicated region fallthrough
CT: control target
= control target key end

     0   :  { %s1843_s24 = smov 0   ;;  %s2017_s0 = inlined_call_operand.vmem [shape: f32[256,32], index: 0, kind: input, shape index: {}]   ;;  %s2018_s1 = inlined_call_operand.vmem [shape: bf16[32,128], index: 1, kind: input, shape index: {}]   ;;  %s2019_s2 = inlined_call_operand.vmem [shape: bf16[3,128,128], index: 2, kind: input, shape index: {}]   ;;  %s2020_s3 = inlined_call_operand.vmem [shape: bf16[128,128], index: 3, kind: input, shape index: {}]   ;;  %s2021_s4 = inlined_call_operand.vmem [shape: f32[1,128], index: 4, kind: input, shape index: {}]   ;;  %s2022_s5 = inlined_call_operand.vmem [shape: f32[3,1,128], index: 5, kind: input, shape index: {}]   ;;  %s2023_s6 = inlined_call_operand.vmem [shape: f32[1,128], index: 6, kind: input, shape index: {}]   ;;  %s2024_s7 = inlined_call_operand.vmem [shape: bf16[256,128], index: 7, kind: output, shape index: {}]  }
   0x1 LB: > { %s1360_s25 = sadd.s32 4294967295, %s1801_s24   ;;  %p1364_p0 = scmp.ge.s32.totalorder %s1801_s24, 1  ;;  %s1801_s24 = sphi %s1843_s24, %s17_s24  }
   0x2   : > { %p238_p1 = scmp.lt.s32.totalorder %s1801_s24, 3 }
   0x4   : > { %p239_p2 = pnand %p1364_p0, %p238_p1 }
   0x5   : > { %v1761_v0 = vld [vmem:[%s2018_s1] sm:$0xff] (!%p239_p2)   ;;  %s1365_s28 = sshll.u32 (!%p239_p2), %s1360_s25, 4  ;;  %v1762_v1 = vld [vmem:[%s2018_s1 + $0x8] sm:$0xff] (!%p239_p2)   ;;  %v1765_v4 = vld [vmem:[%s2019_s2 + $0x10] sm:$0xff] (!%p239_p2)   ;;  %vm330_vm0 = vcmask (!%p239_p2), 261120  }
   0x6   : > { %242 = sbr.rel (%p239_p2) target bundleno = 1152 (0x480), region = 48  ;;  %p271_p3 = scmp.lt.s32.totalorder (!%p239_p2), %s1365_s28, 31  ;;  %1605 = vmatprep.subr.bf16.mxu0 (!%p239_p2), %v1761_v0  ;;  %v1763_v2 = vld [vmem:[%s2019_s2] sm:$0xff] (!%p239_p2)   ;;  %v1764_v3 = vld [vmem:[%s2019_s2 + $0x8] sm:$0xff] (!%p239_p2)   ;;  %v1766_v14 = vld [vmem:[%s2019_s2 + $0x18] sm:$0xff] (!%p239_p2)  }
   0x7   : > { %1606 = vmatpush3.bf16.msra.mxu0 (!%p239_p2), %v1761_v0  ;;  %1625 = vmatprep.subr.bf16.mxu1 (!%p239_p2), %v1763_v2  ;;  %v1767_v18 = vld [vmem:[%s2019_s2 + $0x20] sm:$0xff] (!%p239_p2)   ;;  %v1768_v22 = vld [vmem:[%s2019_s2 + $0x28] sm:$0xff] (!%p239_p2)   ;;  %v1769_v32 = vld [vmem:[%s2019_s2 + $0x30] sm:$0xff] (!%p239_p2)  }
   0x8   : > { %1607 = vmatprep.subr.bf16.mxu0 (!%p239_p2), %v1762_v1  ;;  %1626 = vmatpush3.bf16.msra.mxu1 (!%p239_p2), %v1763_v2  ;;  %v1770_v33 = vld [vmem:[%s2019_s2 + $0x38] sm:$0xff] (!%p239_p2)   ;;  %v1771_v34 = vld [vmem:[%s2019_s2 + $0x40] sm:$0xff] (!%p239_p2)   ;;  %v1772_v35 = vld [vmem:[%s2019_s2 + $0x48] sm:$0xff] (!%p239_p2)  }
   0x9   : > { %1627 = vmatprep.subr.bf16.mxu1 (!%p239_p2), %v1764_v3  ;;  %v1773_v36 = vld [vmem:[%s2019_s2 + $0x50] sm:$0xff] (!%p239_p2)   ;;  %v1774_v37 = vld [vmem:[%s2019_s2 + $0x58] sm:$0xff] (!%p239_p2)   ;;  %v1775_v38 = vld [vmem:[%s2019_s2 + $0x60] sm:$0xff] (!%p239_p2)  }
   0xa   : > { %v1776_v39 = vld [vmem:[%s2019_s2 + $0x68] sm:$0xff] (!%p239_p2)   ;;  %v1369_v40 = vld [vmem:[%s2021_s4] ss:$0 sm:$0xff] (!%p239_p2) }
   0xb   : > { %1608 = vmatpush3.bf16.msra.mxu0 (!%p239_p2), %v1762_v1 }
   0xc   : > { %1628 = vmatpush3.bf16.msra.mxu1 (!%p239_p2), %v1764_v3  ;;  %1657 = vmatprep.subr.bf16.mxu0 (!%p239_p2), %v1771_v34 }
   0xd   : > { %s2026_s28 = smov (!%p271_p3, %s1365_s28), 31  ;;  %1629 = vmatprep.subr.bf16.mxu1 %v1765_v4 }
   0xe   : > { %s1366_s12 = sshll.u32 %s2026_s28, 3  ;;  %s1368_s23 = sshll.u32 %s2026_s28, 2 }
   0xf   : > { %s1869_s15 = scalar_lea.vmem %s2017_s0, %s1366_s12  ;;  %s2004_s27 = scalar_lea.vmem %s2024_s7, %s1368_s23 }
  0x10   : > { %v283_v5 = vld [vmem:[%s1869_s15] sm:$0xff]  ;;  %v284_v6 = vld [vmem:[%s1869_s15 + $0x8] sm:$0xff]  ;;  %v285_v7 = vld [vmem:[%s1869_s15 + $0x10] sm:$0xff]  ;;  %1630 = vmatpush3.bf16.msra.mxu1 %v1765_v4 }
  0x11   : > { %v299_v8 = vpack.c.bf16 %v284_v6, %v283_v5  ;;  %v286_v9 = vld [vmem:[%s1869_s15 + $0x18] sm:$0xff]  ;;  %v287_v10 = vld [vmem:[%s1869_s15 + $0x20] sm:$0xff]  ;;  %v288_v11 = vld [vmem:[%s1869_s15 + $0x28] sm:$0xff]  ;;  %1631 = vmatprep.subr.bf16.mxu1 %v1766_v14 }
  0x12   : > { %v300_v12 = vpack.c.bf16 %v286_v9, %v285_v7  ;;  %v301_v13 = vpack.c.bf16 %v288_v11, %v287_v10  ;;  %v289_v15 = vld [vmem:[%s1869_s15 + $0x30] sm:$0xff]  ;;  %v290_v16 = vld [vmem:[%s1869_s15 + $0x38] sm:$0xff]  ;;  %v291_v17 = vld [vmem:[%s1869_s15 + $0x40] sm:$0xff] }
  0x13   : > { %1609 = vmatprep.mubr.msk.bf16.mxu0 %vm330_vm0, %v299_v8  ;;  %v292_v19 = vld [vmem:[%s1869_s15 + $0x48] sm:$0xff]  ;;  %v302_v20 = vpack.c.bf16 %v290_v16, %v289_v15  ;;  %v293_v23 = vld [vmem:[%s1869_s15 + $0x50] sm:$0xff]  ;;  %v294_v24 = vld [vmem:[%s1869_s15 + $0x58] sm:$0xff] }
  0x14   : > { %1610 = vmatmul.mubr.msk.bf16.vlgmr.msra.gmra.mrb[0].mxu0 %vm330_vm0, %v300_v12  ;;  %v303_v21 = vpack.c.bf16 %v292_v19, %v291_v17  ;;  %1632 = vmatpush3.bf16.msra.mxu1 %v1766_v14  ;;  %v295_v25 = vld [vmem:[%s1869_s15 + $0x60] sm:$0xff]  ;;  %v296_v26 = vld [vmem:[%s1869_s15 + $0x68] sm:$0xff]  ;;  %v304_v27 = vpack.c.bf16 %v294_v24, %v293_v23  ;;  %v297_v29 = vld [vmem:[%s1869_s15 + $0x70] sm:$0xff] }
  0x15   : > { %1613 = vmatprep.mubr.msk.bf16.mxu0 %vm330_vm0, %v301_v13  ;;  %1633 = vmatprep.subr.bf16.mxu1 %v1767_v18  ;;  %v305_v28 = vpack.c.bf16 %v296_v26, %v295_v25  ;;  %v298_v30 = vld [vmem:[%s1869_s15 + $0x78] sm:$0xff] }
  0x16   : > { %v306_v31 = vpack.c.bf16 %v298_v30, %v297_v29  ;;  %1658 = vmatpush3.bf16.msra.mxu0 %v1771_v34  ;;  %v1778_v34 = vld [vmem:[%s2019_s2 + $0x78] sm:$0xff]  }
  0x17   : > { %1659 = vmatprep.subr.bf16.mxu0 %v1772_v35 }
  0x18   : > { %1634 = vmatpush3.bf16.msra.mxu1 %v1767_v18 }
  0x19   : > { %1635 = vmatprep.subr.bf16.mxu1 %v1768_v22 }
  0x1a   : > { %1660 = vmatpush3.bf16.msra.mxu0 %v1772_v35  ;;  %v1779_v35 = vld [vmem:[%s2019_s2 + $0x80] sm:$0xff]  }
  0x1b   : > { %1661 = vmatprep.subr.bf16.mxu0 %v1773_v36 }
  0x1c   : > { %1614 = vmatmul.mubr.msk.bf16.gmra.mrb[4].mxu0 %vm330_vm0, %v302_v20  ;;  %1636 = vmatpush3.bf16.msra.mxu1 %v1768_v22 }
  0x1d   : > { %1617 = vmatprep.mubr.msk.bf16.mxu0 %vm330_vm0, %v303_v21  ;;  %1637 = vmatprep.subr.bf16.mxu1 %v1769_v32 }
  0x1e   : > { %1662 = vmatpush3.bf16.msra.mxu0 %v1773_v36  ;;  %v1780_v36 = vld [vmem:[%s2019_s2 + $0x88] sm:$0xff]  }
  0x1f   : > { %1663 = vmatprep.subr.bf16.mxu0 %v1774_v37 }
  0x20   : > { %1638 = vmatpush3.bf16.msra.mxu1 %v1769_v32 }
  0x21   : > { %1639 = vmatprep.subr.bf16.mxu1 %v1770_v33 }
  0x22   : > { %1664 = vmatpush3.bf16.msra.mxu0 %v1774_v37  ;;  %v1781_v37 = vld [vmem:[%s2019_s2 + $0x90] sm:$0xff]  }
  0x23   : > { %1665 = vmatprep.subr.bf16.mxu0 %v1775_v38 }
  0x24   : > { %1618 = vmatmul.mubr.msk.bf16.gmra.mrb[8].mxu0 %vm330_vm0, %v304_v27  ;;  %1640 = vmatpush3.bf16.msra.mxu1 %v1770_v33  ;;  %v1777_v33 = vld [vmem:[%s2019_s2 + $0x70] sm:$0xff]  }
  0x25   : > { %1621 = vmatprep.mubr.msk.bf16.mxu0 %vm330_vm0, %v305_v28  ;;  %1689 = vmatprep.subr.bf16.mxu1 %v1779_v35 }
  0x26   : > { %1666 = vmatpush3.bf16.msra.mxu0 %v1775_v38  ;;  %v1782_v38 = vld [vmem:[%s2019_s2 + $0x98] sm:$0xff]  }
  0x27   : > { %1667 = vmatprep.subr.bf16.mxu0 %v1776_v39 }
  0x2a   : > { %1668 = vmatpush3.bf16.msra.mxu0 %v1776_v39  ;;  %v1783_v39 = vld [vmem:[%s2019_s2 + $0xa0] sm:$0xff]  }
  0x2b   : > { %1669 = vmatprep.subr.bf16.mxu0 %v1777_v33 }
  0x2c   : > { %1622 = vmatmul.mubr.msk.bf16.gmra.mrb[12].mxu0 %vm330_vm0, %v306_v31 }
  0x2e   : > { %1670 = vmatpush3.bf16.msra.mxu0 %v1777_v33 }
  0x2f   : > { %1671 = vmatprep.subr.bf16.mxu0 %v1778_v34 }
  0x32   : > { %1672 = vmatpush3.bf16.msra.mxu0 %v1778_v34  ;;  %v1785_v34 = vld [vmem:[%s2019_s2 + $0xb0] sm:$0xff]  }
  0xe7   : > { %v1611_v41 = vpop.f32.mrb[0].mxu0 }
  0xe8   : > { %v398_v42 = vadd.f32 %v1611_v41, %v1369_v40  ;;  %v389_v43 = vpop.f32.mrb[1].mxu0  ;;  %v1380_v41 = vld [vmem:[%s2022_s5] ss:$0 sm:$0xff] }
  0xe9   : > { %v390_v44 = vadd.f32 %v1369_v40, %v389_v43  ;;  %v1612_v45 = vpop.f32.mrb[2].mxu0 }
  0xea   : > { %v401_v46 = vadd.f32 %v1612_v45, %v1369_v40  ;;  %v392_v47 = vpop.f32.mrb[3].mxu0  ;;  %v454_v49 = vmax.f32 %v398_v42, 0.0 }
  0xeb   : > { %v393_v48 = vadd.f32 %v1369_v40, %v392_v47  ;;  %v452_v51 = vmax.f32 %v390_v44, 0.0 }
  0xec   : > { %v455_v50 = vmax.f32 %v401_v46, 0.0 }
  0xed   : > { %v453_v52 = vmax.f32 %v393_v48, 0.0 }
  0xee   : > { %v469_v53 = vpack.c.bf16 %v455_v50, %v454_v49 }
  0xef   : > { %v1615_v54 = vpop.f32.mrb[4].mxu0  ;;  %v468_v55 = vpack.c.bf16 %v453_v52, %v452_v51 }
  0xf0   : > { %v414_v56 = vadd.f32 %v1615_v54, %v1369_v40  ;;  %v405_v57 = vpop.f32.mrb[5].mxu0 }
  0xf1   : > { %v406_v58 = vadd.f32 %v1369_v40, %v405_v57  ;;  %v1616_v59 = vpop.f32.mrb[6].mxu0  ;;  %1641 = vmatprep.mubr.bf16.mxu1 %v468_v55 }
  0xf2   : > { %v417_v60 = vadd.f32 %v1616_v59, %v1369_v40  ;;  %v408_v61 = vpop.f32.mrb[7].mxu0  ;;  %1642 = vmatmul.mubr.bf16.vlgmr.msra.gmra.mrb[0].mxu1 %v469_v53  ;;  %v458_v63 = vmax.f32 %v414_v56, 0.0 }
  0xf3   : > { %v409_v62 = vadd.f32 %v1369_v40, %v408_v61  ;;  %v456_v1 = vmax.f32 %v406_v58, 0.0  ;;  %1690 = vmatpush3.bf16.msra.mxu1 %v1779_v35  ;;  %v1786_v35 = vld [vmem:[%s2019_s2 + $0xb8] sm:$0xff]  }
  0xf4   : > { %v459_v0 = vmax.f32 %v417_v60, 0.0  ;;  %1691 = vmatprep.subr.bf16.mxu1 %v1780_v36 }
  0xf5   : > { %v457_v2 = vmax.f32 %v409_v62, 0.0 }
  0xf6   : > { %v471_v3 = vpack.c.bf16 %v459_v0, %v458_v63 }
  0xf7   : > { %v470_v4 = vpack.c.bf16 %v457_v2, %v456_v1  ;;  %v1619_v5 = vpop.f32.mrb[8].mxu0  ;;  %1692 = vmatpush3.bf16.msra.mxu1 %v1780_v36  ;;  %v1787_v36 = vld [vmem:[%s2020_s3] sm:$0xff]  }
  0xf8   : > { %v430_v6 = vadd.f32 %v1619_v5, %v1369_v40  ;;  %v421_v7 = vpop.f32.mrb[9].mxu0  ;;  %1693 = vmatprep.subr.bf16.mxu1 %v1781_v37  ;;  %1721 = vmatprep.subr.bf16.mxu0 %v1787_v36 }
  0xf9   : > { %v422_v8 = vadd.f32 %v1369_v40, %v421_v7  ;;  %v1620_v9 = vpop.f32.mrb[10].mxu0  ;;  %1645 = vmatprep.mubr.bf16.mxu1 %v470_v4 }
  0xfa   : > { %v433_v10 = vadd.f32 %v1620_v9, %v1369_v40  ;;  %v424_v11 = vpop.f32.mrb[11].mxu0  ;;  %1646 = vmatmul.mubr.bf16.gmra.mrb[4].mxu1 %v471_v3  ;;  %v462_v13 = vmax.f32 %v430_v6, 0.0 }
  0xfb   : > { %v425_v12 = vadd.f32 %v1369_v40, %v424_v11  ;;  %v460_v15 = vmax.f32 %v422_v8, 0.0  ;;  %1694 = vmatpush3.bf16.msra.mxu1 %v1781_v37  ;;  %v1788_v37 = vld [vmem:[%s2020_s3 + $0x8] sm:$0xff]  }
  0xfc   : > { %v463_v14 = vmax.f32 %v433_v10, 0.0  ;;  %1695 = vmatprep.subr.bf16.mxu1 %v1782_v38 }
  0xfd   : > { %v461_v16 = vmax.f32 %v425_v12, 0.0 }
  0xfe   : > { %v473_v17 = vpack.c.bf16 %v463_v14, %v462_v13 }
  0xff   : > { %v472_v18 = vpack.c.bf16 %v461_v16, %v460_v15  ;;  %v1623_v19 = vpop.f32.mrb[12].mxu0  ;;  %1696 = vmatpush3.bf16.msra.mxu1 %v1782_v38  ;;  %v1789_v38 = vld [vmem:[%s2020_s3 + $0x10] sm:$0xff]  }
 0x100   : > { %v446_v20 = vadd.f32 %v1623_v19, %v1369_v40  ;;  %v437_v21 = vpop.f32.mrb[13].mxu0  ;;  %1697 = vmatprep.subr.bf16.mxu1 %v1783_v39 }
 0x101   : > { %v438_v22 = vadd.f32 %v1369_v40, %v437_v21  ;;  %v1624_v23 = vpop.f32.mrb[14].mxu0  ;;  %1649 = vmatprep.mubr.bf16.mxu1 %v472_v18 }
 0x102   : > { %v449_v24 = vadd.f32 %v1624_v23, %v1369_v40  ;;  %v440_v25 = vpop.f32.mrb[15].mxu0  ;;  %1650 = vmatmul.mubr.bf16.gmra.mrb[8].mxu1 %v473_v17  ;;  %v466_v27 = vmax.f32 %v446_v20, 0.0 }
 0x103   : > { %v441_v26 = vadd.f32 %v1369_v40, %v440_v25  ;;  %v464_v29 = vmax.f32 %v438_v22, 0.0  ;;  %v1784_v40 = vld [vmem:[%s2019_s2 + $0xa8] sm:$0xff]   ;;  %1698 = vmatpush3.bf16.msra.mxu1 %v1783_v39  ;;  %v1790_v39 = vld [vmem:[%s2020_s3 + $0x18] sm:$0xff]  }
 0x104   : > { %v467_v28 = vmax.f32 %v449_v24, 0.0  ;;  %1699 = vmatprep.subr.bf16.mxu1 %v1784_v40 }
 0x105   : > { %v465_v30 = vmax.f32 %v441_v26, 0.0 }
 0x106   : > { %v475_v31 = vpack.c.bf16 %v467_v28, %v466_v27 }
 0x107   : > { %v474_v32 = vpack.c.bf16 %v465_v30, %v464_v29  ;;  %1700 = vmatpush3.bf16.msra.mxu1 %v1784_v40  ;;  %v1791_v40 = vld [vmem:[%s2020_s3 + $0x20] sm:$0xff]  }
 0x108   : > { %1701 = vmatprep.subr.bf16.mxu1 %v1785_v34 }
 0x109   : > { %1653 = vmatprep.mubr.bf16.mxu1 %v474_v32 }
 0x10a   : > { %1654 = vmatmul.mubr.bf16.gmra.mrb[12].mxu1 %v475_v31 }
 0x10b   : > { %1702 = vmatpush3.bf16.msra.mxu1 %v1785_v34 }
 0x10c   : > { %1703 = vmatprep.subr.bf16.mxu1 %v1786_v35 }
 0x10f   : > { %1704 = vmatpush3.bf16.msra.mxu1 %v1786_v35  ;;  %v1793_v35 = vld [vmem:[%s2020_s3 + $0x30] sm:$0xff]  }
 0x1c5   : > { %v1643_v42 = vpop.f32.mrb[0].mxu1 }
 0x1c6   : > { %v590_v43 = vadd.f32 %v1643_v42, %v1380_v41  ;;  %v581_v44 = vpop.f32.mrb[1].mxu1  ;;  %v1406_v42 = vld [vmem:[%s2022_s5 + $0x1] ss:$0 sm:$0xff] }
 0x1c7   : > { %v582_v45 = vadd.f32 %v1380_v41, %v581_v44  ;;  %v1644_v46 = vpop.f32.mrb[2].mxu1 }
 0x1c8   : > { %v593_v47 = vadd.f32 %v1644_v46, %v1380_v41  ;;  %v584_v48 = vpop.f32.mrb[3].mxu1  ;;  %v646_v50 = vmax.f32 %v590_v43, 0.0 }
 0x1c9   : > { %v585_v49 = vadd.f32 %v1380_v41, %v584_v48  ;;  %v644_v52 = vmax.f32 %v582_v45, 0.0 }
 0x1ca   : > { %v647_v51 = vmax.f32 %v593_v47, 0.0 }
 0x1cb   : > { %v645_v53 = vmax.f32 %v585_v49, 0.0 }
 0x1cc   : > { %v661_v54 = vpack.c.bf16 %v647_v51, %v646_v50 }
 0x1cd   : > { %v660_v55 = vpack.c.bf16 %v645_v53, %v644_v52  ;;  %v1647_v56 = vpop.f32.mrb[4].mxu1 }
 0x1ce   : > { %v606_v57 = vadd.f32 %v1647_v56, %v1380_v41  ;;  %v597_v58 = vpop.f32.mrb[5].mxu1 }
 0x1cf   : > { %v598_v59 = vadd.f32 %v1380_v41, %v597_v58  ;;  %v1648_v60 = vpop.f32.mrb[6].mxu1  ;;  %1673 = vmatprep.mubr.bf16.mxu0 %v660_v55 }
 0x1d0   : > { %v609_v61 = vadd.f32 %v1648_v60, %v1380_v41  ;;  %v600_v62 = vpop.f32.mrb[7].mxu1  ;;  %1674 = vmatmul.mubr.bf16.vlgmr.msra.gmra.mrb[16].mxu0 %v661_v54  ;;  %v650_v0 = vmax.f32 %v606_v57, 0.0 }
 0x1d1   : > { %v601_v63 = vadd.f32 %v1380_v41, %v600_v62  ;;  %v648_v2 = vmax.f32 %v598_v59, 0.0  ;;  %1722 = vmatpush3.bf16.msra.mxu0 %v1787_v36  ;;  %v1794_v36 = vld [vmem:[%s2020_s3 + $0x38] sm:$0xff]  }
 0x1d2   : > { %v651_v1 = vmax.f32 %v609_v61, 0.0  ;;  %1723 = vmatprep.subr.bf16.mxu0 %v1788_v37 }
 0x1d3   : > { %v649_v3 = vmax.f32 %v601_v63, 0.0 }
 0x1d4   : > { %v663_v4 = vpack.c.bf16 %v651_v1, %v650_v0 }
 0x1d5   : > { %v662_v5 = vpack.c.bf16 %v649_v3, %v648_v2  ;;  %v1651_v6 = vpop.f32.mrb[8].mxu1  ;;  %1724 = vmatpush3.bf16.msra.mxu0 %v1788_v37  ;;  %v1432_v37 = vld [vmem:[%s2022_s5 + $0x2] ss:$0 sm:$0xff] }
 0x1d6   : > { %v622_v7 = vadd.f32 %v1651_v6, %v1380_v41  ;;  %v613_v8 = vpop.f32.mrb[9].mxu1  ;;  %1725 = vmatprep.subr.bf16.mxu0 %v1789_v38 }
 0x1d7   : > { %v614_v9 = vadd.f32 %v1380_v41, %v613_v8  ;;  %v1652_v10 = vpop.f32.mrb[10].mxu1  ;;  %1677 = vmatprep.mubr.bf16.mxu0 %v662_v5 }
 0x1d8   : > { %v625_v11 = vadd.f32 %v1652_v10, %v1380_v41  ;;  %v616_v12 = vpop.f32.mrb[11].mxu1  ;;  %1678 = vmatmul.mubr.bf16.gmra.mrb[20].mxu0 %v663_v4  ;;  %v654_v14 = vmax.f32 %v622_v7, 0.0 }
 0x1d9   : > { %v617_v13 = vadd.f32 %v1380_v41, %v616_v12  ;;  %v652_v16 = vmax.f32 %v614_v9, 0.0  ;;  %1726 = vmatpush3.bf16.msra.mxu0 %v1789_v38 }
 0x1da   : > { %v655_v15 = vmax.f32 %v625_v11, 0.0  ;;  %1727 = vmatprep.subr.bf16.mxu0 %v1790_v39 }
 0x1db   : > { %v653_v17 = vmax.f32 %v617_v13, 0.0 }
 0x1dc   : > { %v665_v18 = vpack.c.bf16 %v655_v15, %v654_v14 }
 0x1dd   : > { %v664_v19 = vpack.c.bf16 %v653_v17, %v652_v16  ;;  %v1655_v20 = vpop.f32.mrb[12].mxu1  ;;  %1728 = vmatpush3.bf16.msra.mxu0 %v1790_v39 }
 0x1de   : > { %v638_v21 = vadd.f32 %v1655_v20, %v1380_v41  ;;  %v629_v22 = vpop.f32.mrb[13].mxu1  ;;  %1729 = vmatprep.subr.bf16.mxu0 %v1791_v40 }
 0x1df   : > { %v630_v23 = vadd.f32 %v1380_v41, %v629_v22  ;;  %v1656_v24 = vpop.f32.mrb[14].mxu1  ;;  %1681 = vmatprep.mubr.bf16.mxu0 %v664_v19 }
 0x1e0   : > { %v641_v25 = vadd.f32 %v1656_v24, %v1380_v41  ;;  %v632_v26 = vpop.f32.mrb[15].mxu1  ;;  %1682 = vmatmul.mubr.bf16.gmra.mrb[24].mxu0 %v665_v18  ;;  %v658_v28 = vmax.f32 %v638_v21, 0.0 }
 0x1e1   : > { %v633_v27 = vadd.f32 %v1380_v41, %v632_v26  ;;  %v656_v30 = vmax.f32 %v630_v23, 0.0  ;;  %v1792_v41 = vld [vmem:[%s2020_s3 + $0x28] sm:$0xff]   ;;  %1730 = vmatpush3.bf16.msra.mxu0 %v1791_v40 }
 0x1e2   : > { %v659_v29 = vmax.f32 %v641_v25, 0.0  ;;  %1731 = vmatprep.subr.bf16.mxu0 %v1792_v41 }
 0x1e3   : > { %v657_v31 = vmax.f32 %v633_v27, 0.0 }
 0x1e4   : > { %v667_v32 = vpack.c.bf16 %v659_v29, %v658_v28 }
 0x1e5   : > { %v666_v33 = vpack.c.bf16 %v657_v31, %v656_v30  ;;  %1732 = vmatpush3.bf16.msra.mxu0 %v1792_v41 }
 0x1e6   : > { %1733 = vmatprep.subr.bf16.mxu0 %v1793_v35 }
 0x1e7   : > { %1685 = vmatprep.mubr.bf16.mxu0 %v666_v33 }
 0x1e8   : > { %1686 = vmatmul.mubr.bf16.gmra.mrb[28].mxu0 %v667_v32 }
 0x1e9   : > { %1734 = vmatpush3.bf16.msra.mxu0 %v1793_v35 }
 0x1ea   : > { %1735 = vmatprep.subr.bf16.mxu0 %v1794_v36 }
 0x1ed   : > { %1736 = vmatpush3.bf16.msra.mxu0 %v1794_v36 }
 0x2a3   : > { %v1675_v43 = vpop.f32.mrb[16].mxu0 }
 0x2a4   : > { %v784_v44 = vadd.f32 %v1675_v43, %v1406_v42  ;;  %v775_v45 = vpop.f32.mrb[17].mxu0 }
 0x2a5   : > { %v776_v46 = vadd.f32 %v1406_v42, %v775_v45  ;;  %v1676_v47 = vpop.f32.mrb[18].mxu0 }
 0x2a6   : > { %v787_v48 = vadd.f32 %v1676_v47, %v1406_v42  ;;  %v778_v49 = vpop.f32.mrb[19].mxu0  ;;  %v840_v51 = vmax.f32 %v784_v44, 0.0 }
 0x2a7   : > { %v779_v50 = vadd.f32 %v1406_v42, %v778_v49  ;;  %v838_v53 = vmax.f32 %v776_v46, 0.0 }
 0x2a8   : > { %v841_v52 = vmax.f32 %v787_v48, 0.0 }
 0x2a9   : > { %v839_v54 = vmax.f32 %v779_v50, 0.0 }
 0x2aa   : > { %v855_v55 = vpack.c.bf16 %v841_v52, %v840_v51 }
 0x2ab   : > { %v854_v56 = vpack.c.bf16 %v839_v54, %v838_v53  ;;  %v1679_v57 = vpop.f32.mrb[20].mxu0 }
 0x2ac   : > { %v800_v58 = vadd.f32 %v1679_v57, %v1406_v42  ;;  %v791_v59 = vpop.f32.mrb[21].mxu0 }
 0x2ad   : > { %v792_v60 = vadd.f32 %v1406_v42, %v791_v59  ;;  %v1680_v61 = vpop.f32.mrb[22].mxu0  ;;  %1705 = vmatprep.mubr.bf16.mxu1 %v854_v56 }
 0x2ae   : > { %v803_v62 = vadd.f32 %v1680_v61, %v1406_v42  ;;  %v794_v63 = vpop.f32.mrb[23].mxu0  ;;  %1706 = vmatmul.mubr.bf16.vlgmr.msra.gmra.mrb[16].mxu1 %v855_v55  ;;  %v844_v1 = vmax.f32 %v800_v58, 0.0 }
 0x2af   : > { %v795_v0 = vadd.f32 %v1406_v42, %v794_v63  ;;  %v842_v3 = vmax.f32 %v792_v60, 0.0 }
 0x2b0   : > { %v845_v2 = vmax.f32 %v803_v62, 0.0 }
 0x2b1   : > { %v843_v4 = vmax.f32 %v795_v0, 0.0 }
 0x2b2   : > { %v857_v5 = vpack.c.bf16 %v845_v2, %v844_v1 }
 0x2b3   : > { %v856_v6 = vpack.c.bf16 %v843_v4, %v842_v3  ;;  %v1683_v7 = vpop.f32.mrb[24].mxu0 }
 0x2b4   : > { %v816_v8 = vadd.f32 %v1683_v7, %v1406_v42  ;;  %v807_v9 = vpop.f32.mrb[25].mxu0 }
 0x2b5   : > { %v808_v10 = vadd.f32 %v1406_v42, %v807_v9  ;;  %v1684_v11 = vpop.f32.mrb[26].mxu0  ;;  %1709 = vmatprep.mubr.bf16.mxu1 %v856_v6 }
 0x2b6   : > { %v819_v12 = vadd.f32 %v1684_v11, %v1406_v42  ;;  %v810_v13 = vpop.f32.mrb[27].mxu0  ;;  %1710 = vmatmul.mubr.bf16.gmra.mrb[20].mxu1 %v857_v5  ;;  %v848_v15 = vmax.f32 %v816_v8, 0.0 }
 0x2b7   : > { %v811_v14 = vadd.f32 %v1406_v42, %v810_v13  ;;  %v846_v17 = vmax.f32 %v808_v10, 0.0 }
 0x2b8   : > { %v849_v16 = vmax.f32 %v819_v12, 0.0 }
 0x2b9   : > { %v847_v18 = vmax.f32 %v811_v14, 0.0 }
 0x2ba   : > { %v859_v19 = vpack.c.bf16 %v849_v16, %v848_v15 }
 0x2bb   : > { %v858_v20 = vpack.c.bf16 %v847_v18, %v846_v17  ;;  %v1687_v21 = vpop.f32.mrb[28].mxu0 }
 0x2bc   : > { %v832_v22 = vadd.f32 %v1687_v21, %v1406_v42  ;;  %v823_v23 = vpop.f32.mrb[29].mxu0 }
 0x2bd   : > { %v824_v24 = vadd.f32 %v1406_v42, %v823_v23  ;;  %v1688_v25 = vpop.f32.mrb[30].mxu0  ;;  %1713 = vmatprep.mubr.bf16.mxu1 %v858_v20 }
 0x2be   : > { %v835_v26 = vadd.f32 %v1688_v25, %v1406_v42  ;;  %v826_v27 = vpop.f32.mrb[31].mxu0  ;;  %1714 = vmatmul.mubr.bf16.gmra.mrb[24].mxu1 %v859_v19  ;;  %v852_v29 = vmax.f32 %v832_v22, 0.0 }
 0x2bf   : > { %v827_v28 = vadd.f32 %v1406_v42, %v826_v27  ;;  %v850_v31 = vmax.f32 %v824_v24, 0.0 }
 0x2c0   : > { %v853_v30 = vmax.f32 %v835_v26, 0.0 }
 0x2c1   : > { %v851_v32 = vmax.f32 %v827_v28, 0.0 }
 0x2c2   : > { %v861_v33 = vpack.c.bf16 %v853_v30, %v852_v29 }
 0x2c3   : > { %v860_v34 = vpack.c.bf16 %v851_v32, %v850_v31  ;;  %v1441_v31 = vld [vmem:[%s2023_s6] ss:$0 sm:$0xff] }
 0x2c5   : > { %1717 = vmatprep.mubr.bf16.mxu1 %v860_v34 }
 0x2c6   : > { %1718 = vmatmul.mubr.bf16.gmra.mrb[28].mxu1 %v861_v33 }
 0x381   : > { %v1707_v38 = vpop.f32.mrb[16].mxu1 }
 0x382   : > { %v978_v39 = vadd.f32 %v1707_v38, %v1432_v37  ;;  %v969_v40 = vpop.f32.mrb[17].mxu1 }
 0x383   : > { %v970_v41 = vadd.f32 %v1432_v37, %v969_v40  ;;  %v1708_v42 = vpop.f32.mrb[18].mxu1 }
 0x384   : > { %v981_v43 = vadd.f32 %v1708_v42, %v1432_v37  ;;  %v972_v44 = vpop.f32.mrb[19].mxu1  ;;  %v1034_v46 = vmax.f32 %v978_v39, 0.0 }
 0x385   : > { %v973_v45 = vadd.f32 %v1432_v37, %v972_v44  ;;  %v1032_v48 = vmax.f32 %v970_v41, 0.0 }
 0x386   : > { %v1035_v47 = vmax.f32 %v981_v43, 0.0 }
 0x387   : > { %v1033_v49 = vmax.f32 %v973_v45, 0.0 }
 0x388   : > { %v1049_v50 = vpack.c.bf16 %v1035_v47, %v1034_v46 }
 0x389   : > { %v1048_v51 = vpack.c.bf16 %v1033_v49, %v1032_v48  ;;  %v1711_v52 = vpop.f32.mrb[20].mxu1 }
 0x38a   : > { %v994_v53 = vadd.f32 %v1711_v52, %v1432_v37  ;;  %v985_v54 = vpop.f32.mrb[21].mxu1 }
 0x38b   : > { %v986_v55 = vadd.f32 %v1432_v37, %v985_v54  ;;  %v1712_v56 = vpop.f32.mrb[22].mxu1  ;;  %1737 = vmatprep.mubr.bf16.mxu0 %v1048_v51 }
 0x38c   : > { %v997_v57 = vadd.f32 %v1712_v56, %v1432_v37  ;;  %v988_v58 = vpop.f32.mrb[23].mxu1  ;;  %1738 = vmatmul.mubr.bf16.vlgmr.msra.gmra.mrb[32].mxu0 %v1049_v50  ;;  %v1038_v60 = vmax.f32 %v994_v53, 0.0 }
 0x38d   : > { %v989_v59 = vadd.f32 %v1432_v37, %v988_v58  ;;  %v1036_v62 = vmax.f32 %v986_v55, 0.0 }
 0x38e   : > { %v1039_v61 = vmax.f32 %v997_v57, 0.0 }
 0x38f   : > { %v1037_v63 = vmax.f32 %v989_v59, 0.0 }
 0x390   : > { %v1051_v0 = vpack.c.bf16 %v1039_v61, %v1038_v60 }
 0x391   : > { %v1050_v1 = vpack.c.bf16 %v1037_v63, %v1036_v62  ;;  %v1715_v2 = vpop.f32.mrb[24].mxu1 }
 0x392   : > { %v1010_v3 = vadd.f32 %v1715_v2, %v1432_v37  ;;  %v1001_v4 = vpop.f32.mrb[25].mxu1 }
 0x393   : > { %v1002_v5 = vadd.f32 %v1432_v37, %v1001_v4  ;;  %v1716_v6 = vpop.f32.mrb[26].mxu1  ;;  %1741 = vmatprep.mubr.bf16.mxu0 %v1050_v1 }
 0x394   : > { %v1013_v7 = vadd.f32 %v1716_v6, %v1432_v37  ;;  %v1004_v8 = vpop.f32.mrb[27].mxu1  ;;  %1742 = vmatmul.mubr.bf16.gmra.mrb[36].mxu0 %v1051_v0  ;;  %v1042_v10 = vmax.f32 %v1010_v3, 0.0 }
 0x395   : > { %v1005_v9 = vadd.f32 %v1432_v37, %v1004_v8  ;;  %v1040_v12 = vmax.f32 %v1002_v5, 0.0 }
 0x396   : > { %v1043_v11 = vmax.f32 %v1013_v7, 0.0 }
 0x397   : > { %v1041_v13 = vmax.f32 %v1005_v9, 0.0 }
 0x398   : > { %v1053_v14 = vpack.c.bf16 %v1043_v11, %v1042_v10 }
 0x399   : > { %v1052_v15 = vpack.c.bf16 %v1041_v13, %v1040_v12  ;;  %v1719_v16 = vpop.f32.mrb[28].mxu1 }
 0x39a   : > { %v1026_v17 = vadd.f32 %v1719_v16, %v1432_v37  ;;  %v1017_v18 = vpop.f32.mrb[29].mxu1 }
 0x39b   : > { %v1018_v19 = vadd.f32 %v1432_v37, %v1017_v18  ;;  %v1720_v20 = vpop.f32.mrb[30].mxu1  ;;  %1745 = vmatprep.mubr.bf16.mxu0 %v1052_v15 }
 0x39c   : > { %v1029_v21 = vadd.f32 %v1720_v20, %v1432_v37  ;;  %v1020_v22 = vpop.f32.mrb[31].mxu1  ;;  %1746 = vmatmul.mubr.bf16.gmra.mrb[40].mxu0 %v1053_v14  ;;  %v1046_v24 = vmax.f32 %v1026_v17, 0.0 }
 0x39d   : > { %v1021_v23 = vadd.f32 %v1432_v37, %v1020_v22  ;;  %v1044_v26 = vmax.f32 %v1018_v19, 0.0 }
 0x39e   : > { %v1047_v25 = vmax.f32 %v1029_v21, 0.0 }
 0x39f   : > { %v1045_v27 = vmax.f32 %v1021_v23, 0.0 }
 0x3a0   : > { %v1055_v28 = vpack.c.bf16 %v1047_v25, %v1046_v24 }
 0x3a1   : > { %v1054_v29 = vpack.c.bf16 %v1045_v27, %v1044_v26 }
 0x3a3   : > { %1749 = vmatprep.mubr.bf16.mxu0 %v1054_v29 }
 0x3a4   : > { %1750 = vmatmul.mubr.bf16.gmra.mrb[44].mxu0 %v1055_v28 }
 0x45f   : > { %v1739_v30 = vpop.f32.mrb[32].mxu0 }
 0x460   : > { %v1161_v32 = vpop.f32.mrb[33].mxu0  ;;  %v1170_v34 = vadd.f32 %v1739_v30, %v1441_v31 }
 0x461   : > { %v1740_v33 = vpop.f32.mrb[34].mxu0  ;;  %v1162_v37 = vadd.f32 %v1441_v31, %v1161_v32 }
 0x462   : > { %v1173_v35 = vadd.f32 %v1740_v33, %v1441_v31  ;;  %v1164_v36 = vpop.f32.mrb[35].mxu0 }
 0x463   : > { %v1165_v38 = vadd.f32 %v1441_v31, %v1164_v36 }
 0x464   : > { %v1492_v39 = vpack.c.bf16 %v1173_v35, %v1170_v34 }
 0x465   : > { %v1487_v40 = vpack.c.bf16 %v1165_v38, %v1162_v37 }
 0x466   : > { %1524 = vst [vmem:[%s2004_s27 + $0x8] sm:$0xff] %v1492_v39  }
 0x467   : > { %1488 = vst [vmem:[%s2004_s27] sm:$0xff] %v1487_v40   ;;  %v1743_v41 = vpop.f32.mrb[36].mxu0 }
 0x468   : > { %v1177_v42 = vpop.f32.mrb[37].mxu0  ;;  %v1186_v44 = vadd.f32 %v1743_v41, %v1441_v31 }
 0x469   : > { %v1744_v43 = vpop.f32.mrb[38].mxu0  ;;  %v1178_v47 = vadd.f32 %v1441_v31, %v1177_v42 }
 0x46a   : > { %v1189_v45 = vadd.f32 %v1744_v43, %v1441_v31  ;;  %v1180_v46 = vpop.f32.mrb[39].mxu0 }
 0x46b   : > { %v1181_v48 = vadd.f32 %v1441_v31, %v1180_v46 }
 0x46c   : > { %v1502_v49 = vpack.c.bf16 %v1189_v45, %v1186_v44 }
 0x46d   : > { %v1497_v50 = vpack.c.bf16 %v1181_v48, %v1178_v47 }
 0x46e   : > { %1526 = vst [vmem:[%s2004_s27 + $0x18] sm:$0xff] %v1502_v49  }
 0x46f   : > { %1525 = vst [vmem:[%s2004_s27 + $0x10] sm:$0xff] %v1497_v50   ;;  %v1747_v51 = vpop.f32.mrb[40].mxu0 }
 0x470   : > { %v1193_v52 = vpop.f32.mrb[41].mxu0  ;;  %v1202_v54 = vadd.f32 %v1747_v51, %v1441_v31 }
 0x471   : > { %v1748_v53 = vpop.f32.mrb[42].mxu0  ;;  %v1194_v57 = vadd.f32 %v1441_v31, %v1193_v52 }
 0x472   : > { %v1205_v55 = vadd.f32 %v1748_v53, %v1441_v31  ;;  %v1196_v56 = vpop.f32.mrb[43].mxu0 }
 0x473   : > { %v1197_v58 = vadd.f32 %v1441_v31, %v1196_v56 }
 0x474   : > { %v1512_v59 = vpack.c.bf16 %v1205_v55, %v1202_v54 }
 0x475   : > { %v1507_v60 = vpack.c.bf16 %v1197_v58, %v1194_v57 }
 0x476   : > { %1528 = vst [vmem:[%s2004_s27 + $0x28] sm:$0xff] %v1512_v59  }
 0x477   : > { %1527 = vst [vmem:[%s2004_s27 + $0x20] sm:$0xff] %v1507_v60   ;;  %v1751_v61 = vpop.f32.mrb[44].mxu0 }
 0x478   : > { %v1209_v62 = vpop.f32.mrb[45].mxu0  ;;  %v1218_v0 = vadd.f32 %v1751_v61, %v1441_v31 }
 0x479   : > { %v1752_v63 = vpop.f32.mrb[46].mxu0  ;;  %v1210_v3 = vadd.f32 %v1441_v31, %v1209_v62 }
 0x47a   : > { %v1221_v1 = vadd.f32 %v1752_v63, %v1441_v31  ;;  %v1212_v2 = vpop.f32.mrb[47].mxu0 }
 0x47b   : > { %v1213_v4 = vadd.f32 %v1441_v31, %v1212_v2 }
 0x47c   : > { %v1522_v5 = vpack.c.bf16 %v1221_v1, %v1218_v0 }
 0x47d   : > { %v1517_v6 = vpack.c.bf16 %v1213_v4, %v1210_v3 }
 0x47e   : > { %1530 = vst [vmem:[%s2004_s27 + $0x38] sm:$0xff] %v1522_v5  }
 0x47f   : > { %1529 = vst [vmem:[%s2004_s27 + $0x30] sm:$0xff] %v1517_v6  }
 0x480 PF: > { %s17_s24 = sadd.s32 1, %s1801_s24  }
 0x481   : > { %p14_p4 = scmp.ge.s32.totalorder %s17_s24, 4  }
 0x483   :  { %16 = sbr.rel (!%p14_p4) target bundleno = 1 (0x1), region = 82 }

</bundles_post_ra>
